<compile_context>
chip_gen: v6e
topology: v6e:2x2x1
jax: 0.10.0
libtpu: 0.0.40
codegen_flags: <defaults>
</compile_context>

<pallas_src>
import jax
import jax.numpy as jnp
from jax.experimental import pallas as pl
from jax.experimental.pallas import tpu as pltpu


Q_PAD = 8            # quantile outputs padded to 8 sublanes (not 128 lanes)
TB_DEFAULT = 4096    # batch-tile rows (multiple of 128); sweep 4096/8192 on big batches


def _round_up(n, m):
    return ((n + m - 1) // m) * m


def q_model_kernel(x_ref, w1_ref, b1_ref, w2_ref, b2_ref, wf_ref, bf_ref, o_ref):
    # One batch tile: three fused matmuls + ReLU; all weights resident in VMEM.
    x = x_ref[...]                                                      # (TB, 77)

    h1 = jnp.dot(x, w1_ref[...], preferred_element_type=jnp.float32) + b1_ref[...]
    h1 = jnp.maximum(h1, 0.0)                                           # (TB, 50)

    h2 = jnp.dot(h1, w2_ref[...], preferred_element_type=jnp.float32) + b2_ref[...]
    h2 = jnp.maximum(h2, 0.0)                                           # (TB, 20)

    # Final projection computed transposed: (8,20) x (TB,20) contracting the
    # 20-dim of both -> (8, TB). Batch stays on the lane axis so the HBM store
    # is lane-dense (no masked vst, no 128-lane padding of the Q outputs).
    y = jax.lax.dot_general(wf_ref[...], h2,
                            dimension_numbers=(((1,), (1,)), ((), ())),
                            preferred_element_type=jnp.float32)
    o_ref[...] = (y + bf_ref[...]).astype(o_ref.dtype)


def q_model_forward(x, params, num_quantiles, tb=TB_DEFAULT):
    """x: [B, len_features] float32 -> [B, num_quantiles] float32."""
    w1t, b1, w2t, b2, wf8, bf8 = params
    B, F = x.shape
    q_pad = wf8.shape[0]                       # 8

    # Batch tile: multiple of 128 (it is the lane dim of the transposed output
    # block), capped so tiny batches still produce a single partial block.
    TB = min(tb, _round_up(B, 128))
    grid = (pl.cdiv(B, TB),)                   # ragged tail, no batch padding

    cost = pl.CostEstimate(
        flops=2 * B * (F * 50 + 50 * 20 + 20 * q_pad),
        transcendentals=0,
        bytes_accessed=4 * (B * F + q_pad * B
                            + w1t.size + w2t.size + wf8.size
                            + b1.size + b2.size + bf8.size),
    )

    out_t = pl.pallas_call(
        q_model_kernel,
        out_shape=jax.ShapeDtypeStruct((q_pad, B), jnp.float32),
        grid=grid,
        in_specs=[
            pl.BlockSpec((TB, F), lambda i: (i, 0)),        # x tile (unpadded)
            pl.BlockSpec(w1t.shape, lambda i: (0, 0)),      # W1t [77,50] (resident)
            pl.BlockSpec(b1.shape, lambda i: (0, 0)),       # b1  [1,50]
            pl.BlockSpec(w2t.shape, lambda i: (0, 0)),      # W2t [50,20]
            pl.BlockSpec(b2.shape, lambda i: (0, 0)),       # b2  [1,20]
            pl.BlockSpec(wf8.shape, lambda i: (0, 0)),      # Wf  [8,20]
            pl.BlockSpec(bf8.shape, lambda i: (0, 0)),      # bf  [8,1]
        ],
        out_specs=pl.BlockSpec((q_pad, TB), lambda i: (0, i)),   # transposed out
        compiler_params=pltpu.CompilerParams(
            dimension_semantics=("parallel",),
            vmem_limit_bytes=32 << 20,
        ),
        cost_estimate=cost,
    )(x, w1t, b1, w2t, b2, wf8, bf8)

    return out_t[:num_quantiles, :].T


def orthogonal(key, rows, cols, dtype=jnp.float32):
    """Deterministic orthogonal init (same semantics as nn.init.orthogonal_)."""
    big, small = max(rows, cols), min(rows, cols)
    a = jax.random.normal(key, (big, small), dtype=jnp.float32)
    q, r = jnp.linalg.qr(a)
    q = q * jnp.sign(jnp.diag(r))[None, :]
    if rows < cols:
        q = q.T
    return q.astype(dtype)


def init_params(key, len_features=77, quantiles=(0.1, 0.5, 0.9)):
    num_q = len(quantiles)
    k1, k2, *kf = jax.random.split(key, 2 + num_q)

    # nn.Linear stores weight as [out, in].
    w1 = orthogonal(k1, 50, len_features)            # [50, 77]
    w2 = orthogonal(k2, 20, 50)                      # [20, 50]
    wf_rows = [orthogonal(k, 1, 20) for k in kf]     # Q x [1, 20]
    wf = jnp.concatenate(wf_rows, axis=0)            # [Q, 20]

    # Pre-transpose hidden-layer weights to [in, out]; keep the fused final
    # weight in [out, in] = [Q, 20], zero-padded to 8 output rows (sublanes).
    w1t = w1.T                                                     # [77, 50]
    w2t = w2.T                                                     # [50, 20]
    wf8 = jnp.zeros((Q_PAD, 20), jnp.float32).at[:num_q, :].set(wf)  # [8, 20]

    b1 = jnp.zeros((1, 50), jnp.float32)
    b2 = jnp.zeros((1, 20), jnp.float32)
    bf8 = jnp.zeros((Q_PAD, 1), jnp.float32)
    return (w1t, b1, w2t, b2, wf8, bf8)


def reference_forward(x, params, num_quantiles):
    """Pure-JAX reference of the PyTorch forward."""
    w1t, b1, w2t, b2, wf8, bf8 = params
    h1 = jnp.maximum(x @ w1t + b1, 0.0)
    h2 = jnp.maximum(h1 @ w2t + b2, 0.0)
    return h2 @ wf8[:num_quantiles, :].T + bf8[:num_quantiles, 0]


if __name__ == "__main__":
    quantiles = (0.1, 0.5, 0.9)
    len_features = 77
    batch = 10   # deliberately not a multiple of 8 to exercise the masked tail

    key = jax.random.PRNGKey(0)
    k_params, k_x = jax.random.split(key)
    params = init_params(k_params, len_features=len_features, quantiles=quantiles)
    x = jax.random.normal(k_x, (batch, len_features), dtype=jnp.float32)

    out = q_model_forward(x, params, num_quantiles=len(quantiles))
    out = jax.block_until_ready(out)

    ref = reference_forward(x, params, num_quantiles=len(quantiles))
    assert out.shape == (batch, len(quantiles)), out.shape
    assert jnp.allclose(out, ref, atol=1e-4, rtol=1e-4), "mismatch vs reference"

    print("KERNEL_OK")
</pallas_src>

<mosaic_0001>
module attributes {stable_mosaic.version = 11 : i64} {
  func.func @q_model_kernel(%arg0: i32, %arg1: memref<128x77xf32, #tpu.memory_space<vmem>>, %arg2: memref<77x50xf32, #tpu.memory_space<vmem>>, %arg3: memref<1x50xf32, #tpu.memory_space<vmem>>, %arg4: memref<50x20xf32, #tpu.memory_space<vmem>>, %arg5: memref<1x20xf32, #tpu.memory_space<vmem>>, %arg6: memref<8x20xf32, #tpu.memory_space<vmem>>, %arg7: memref<8x1xf32, #tpu.memory_space<vmem>>, %arg8: memref<8x128xf32, #tpu.memory_space<vmem>>) attributes {dimension_semantics = [#tpu.dimension_semantics<parallel>], iteration_bounds = array<i64: 1>, scalar_prefetch = 0 : i64, scratch_operands = 0 : i64, tpu.core_type = #tpu.core_type<tc>, window_params = [{transform_indices = @transform_0, window_bounds = array<i64: 128, 77>}, {pipeline_mode = #tpu.pipeline_mode<synchronous>, transform_indices = @transform_1, window_bounds = array<i64: 77, 50>}, {pipeline_mode = #tpu.pipeline_mode<synchronous>, transform_indices = @transform_2, window_bounds = array<i64: 1, 50>}, {pipeline_mode = #tpu.pipeline_mode<synchronous>, transform_indices = @transform_3, window_bounds = array<i64: 50, 20>}, {pipeline_mode = #tpu.pipeline_mode<synchronous>, transform_indices = @transform_4, window_bounds = array<i64: 1, 20>}, {pipeline_mode = #tpu.pipeline_mode<synchronous>, transform_indices = @transform_5, window_bounds = array<i64: 8, 20>}, {pipeline_mode = #tpu.pipeline_mode<synchronous>, transform_indices = @transform_6, window_bounds = array<i64: 8, 1>}, {transform_indices = @transform_7, window_bounds = array<i64: 8, 128>}]} {
    %c0 = arith.constant 0 : index
    %c0_0 = arith.constant 0 : index
    %0 = vector.load %arg1[%c0, %c0_0] : memref<128x77xf32, #tpu.memory_space<vmem>>, vector<128x77xf32>
    %c0_1 = arith.constant 0 : index
    %c0_2 = arith.constant 0 : index
    %1 = vector.load %arg2[%c0_1, %c0_2] : memref<77x50xf32, #tpu.memory_space<vmem>>, vector<77x50xf32>
    %cst = arith.constant dense<0.000000e+00> : vector<128x50xf32>
    %2 = tpu.matmul %0, %1, %cst {dimension_numbers = #tpu.dot_dimension_numbers<[1], [0], [0], [1], [0, 0, 1, 1], [], []>} : vector<128x77xf32>, vector<77x50xf32>, vector<128x50xf32> -> vector<128x50xf32>
    %c0_3 = arith.constant 0 : index
    %c0_4 = arith.constant 0 : index
    %3 = vector.load %arg3[%c0_3, %c0_4] : memref<1x50xf32, #tpu.memory_space<vmem>>, vector<1x50xf32>
    %4 = vector.broadcast %3 : vector<1x50xf32> to vector<128x50xf32>
    %5 = arith.addf %2, %4 : vector<128x50xf32>
    %cst_5 = arith.constant 0.000000e+00 : f32
    %6 = vector.broadcast %cst_5 : f32 to vector<128x50xf32>
    %7 = arith.maximumf %5, %6 : vector<128x50xf32>
    %c0_6 = arith.constant 0 : index
    %c0_7 = arith.constant 0 : index
    %8 = vector.load %arg4[%c0_6, %c0_7] : memref<50x20xf32, #tpu.memory_space<vmem>>, vector<50x20xf32>
    %cst_8 = arith.constant dense<0.000000e+00> : vector<128x20xf32>
    %9 = tpu.matmul %7, %8, %cst_8 {dimension_numbers = #tpu.dot_dimension_numbers<[1], [0], [0], [1], [0, 0, 1, 1], [], []>} : vector<128x50xf32>, vector<50x20xf32>, vector<128x20xf32> -> vector<128x20xf32>
    %c0_9 = arith.constant 0 : index
    %c0_10 = arith.constant 0 : index
    %10 = vector.load %arg5[%c0_9, %c0_10] : memref<1x20xf32, #tpu.memory_space<vmem>>, vector<1x20xf32>
    %11 = vector.broadcast %10 : vector<1x20xf32> to vector<128x20xf32>
    %12 = arith.addf %9, %11 : vector<128x20xf32>
    %cst_11 = arith.constant 0.000000e+00 : f32
    %13 = vector.broadcast %cst_11 : f32 to vector<128x20xf32>
    %14 = arith.maximumf %12, %13 : vector<128x20xf32>
    %c0_12 = arith.constant 0 : index
    %c0_13 = arith.constant 0 : index
    %15 = vector.load %arg6[%c0_12, %c0_13] : memref<8x20xf32, #tpu.memory_space<vmem>>, vector<8x20xf32>
    %cst_14 = arith.constant dense<0.000000e+00> : vector<8x128xf32>
    %16 = tpu.matmul %15, %14, %cst_14 {dimension_numbers = #tpu.dot_dimension_numbers<[1], [1], [0], [0], [0, 0, 1, 0], [], []>} : vector<8x20xf32>, vector<128x20xf32>, vector<8x128xf32> -> vector<8x128xf32>
    %c0_15 = arith.constant 0 : index
    %c0_16 = arith.constant 0 : index
    %17 = vector.load %arg7[%c0_15, %c0_16] : memref<8x1xf32, #tpu.memory_space<vmem>>, vector<8x1xf32>
    %18 = vector.broadcast %17 : vector<8x1xf32> to vector<8x128xf32>
    %19 = arith.addf %16, %18 : vector<8x128xf32>
    %c0_17 = arith.constant 0 : index
    %c0_18 = arith.constant 0 : index
    %20 = vector.load %arg8[%c0_17, %c0_18] : memref<8x128xf32, #tpu.memory_space<vmem>>, vector<8x128xf32>
    tpu.vector_store %arg8[%c0_17, %c0_18], %19 {strides = array<i32>} : memref<8x128xf32, #tpu.memory_space<vmem>>, vector<8x128xf32>,
    return
  }
  func.func @transform_0(%arg0: i32) -> (i32, i32) {
    %c0_i32 = arith.constant 0 : i32
    %c0_i32_0 = arith.constant 0 : i32
    return %arg0, %c0_i32 : i32, i32
  }
  func.func @transform_1(%arg0: i32) -> (i32, i32) {
    %c0_i32 = arith.constant 0 : i32
    %c0_i32_0 = arith.constant 0 : i32
    %c0_i32_1 = arith.constant 0 : i32
    return %c0_i32, %c0_i32_0 : i32, i32
  }
  func.func @transform_2(%arg0: i32) -> (i32, i32) {
    %c0_i32 = arith.constant 0 : i32
    %c0_i32_0 = arith.constant 0 : i32
    %c0_i32_1 = arith.constant 0 : i32
    return %c0_i32, %c0_i32_0 : i32, i32
  }
  func.func @transform_3(%arg0: i32) -> (i32, i32) {
    %c0_i32 = arith.constant 0 : i32
    %c0_i32_0 = arith.constant 0 : i32
    %c0_i32_1 = arith.constant 0 : i32
    return %c0_i32, %c0_i32_0 : i32, i32
  }
  func.func @transform_4(%arg0: i32) -> (i32, i32) {
    %c0_i32 = arith.constant 0 : i32
    %c0_i32_0 = arith.constant 0 : i32
    %c0_i32_1 = arith.constant 0 : i32
    return %c0_i32, %c0_i32_0 : i32, i32
  }
  func.func @transform_5(%arg0: i32) -> (i32, i32) {
    %c0_i32 = arith.constant 0 : i32
    %c0_i32_0 = arith.constant 0 : i32
    %c0_i32_1 = arith.constant 0 : i32
    return %c0_i32, %c0_i32_0 : i32, i32
  }
  func.func @transform_6(%arg0: i32) -> (i32, i32) {
    %c0_i32 = arith.constant 0 : i32
    %c0_i32_0 = arith.constant 0 : i32
    %c0_i32_1 = arith.constant 0 : i32
    return %c0_i32, %c0_i32_0 : i32, i32
  }
  func.func @transform_7(%arg0: i32) -> (i32, i32) {
    %c0_i32 = arith.constant 0 : i32
    %c0_i32_0 = arith.constant 0 : i32
    return %c0_i32, %arg0 : i32, i32
  }
}

</mosaic_0001>

<bundles_post_ra>
// kernel: tpu_custom_call.1
= control target key start
LH: loop header
LB: loop body
LE: loop exit
PB: predicated region body
PF: predicated region fallthrough
CT: control target
= control target key end

     0   :  { %vm109_vm0 = vcmask 1044480   ;;  %vm60_vm1 = vcmask 629760   ;;  %vm337_vm2 = vcmask 1041408   ;;  %s1142_s0 = inlined_call_operand.vmem [shape: f32[10,77], index: 0, kind: input, shape index: {}]   ;;  %s1143_s1 = inlined_call_operand.vmem [shape: f32[77,50], index: 1, kind: input, shape index: {}]   ;;  %s1144_s2 = inlined_call_operand.vmem [shape: f32[1,50], index: 2, kind: input, shape index: {}]   ;;  %s1145_s3 = inlined_call_operand.vmem [shape: f32[50,20], index: 3, kind: input, shape index: {}]   ;;  %s1146_s4 = inlined_call_operand.vmem [shape: f32[1,20], index: 4, kind: input, shape index: {}]   ;;  %s1147_s5 = inlined_call_operand.vmem [shape: f32[8,20], index: 5, kind: input, shape index: {}]   ;;  %s1148_s6 = inlined_call_operand.vmem [shape: f32[8,1], index: 6, kind: input, shape index: {}]   ;;  %s1149_s7 = inlined_call_operand.hbm [shape: f32[8,10], index: 7, kind: output, shape index: {}]  }
   0x1   :  { %v52_v0 = vld [vmem:[%s1143_s1 + $0x48] sm:$0x1f]  ;;  %v51_v1 = vld [vmem:[%s1143_s1 + $0x40] sm:$0xff]  ;;  %v50_v2 = vld [vmem:[%s1143_s1 + $0x38] sm:$0xff] }
   0x2   :  { %765 = vmatprep.subr.msk.mxu0 %vm109_vm0, %v52_v0  ;;  %v27_v3 = vld [vmem:[%s1142_s0] sm:$0xff]  ;;  %v49_v4 = vld [vmem:[%s1143_s1 + $0x30] sm:$0xff]  ;;  %v48_v5 = vld [vmem:[%s1143_s1 + $0x28] sm:$0xff] }
   0x3   :  { %766 = vmatpush3.msk.msra.mxu0 %vm109_vm0, %v52_v0  ;;  %785 = vmatprep.mubr.msk.f32.mxu0 %vm60_vm1, %v27_v3  ;;  %v47_v6 = vld [vmem:[%s1143_s1 + $0x20] sm:$0xff]  ;;  %v280_v7 = vld [vmem:[%s1145_s3 + $0x30] sm:$0x3]  ;;  %v279_v8 = vld [vmem:[%s1145_s3 + $0x28] sm:$0xff] }
   0x4   :  { %767 = vmatprep.subr.mxu0 %v51_v1  ;;  %809 = vmatprep.subr.msk.mxu1 %vm337_vm2, %v280_v7 }
   0x5   :  { %768 = vmatpush3.msra.mxu0 %v51_v1 }
   0x6   :  { %769 = vmatprep.subr.mxu0 %v50_v2 }
   0x7   :  { %770 = vmatpush3.msra.mxu0 %v50_v2 }
   0x8   :  { %771 = vmatprep.subr.mxu0 %v49_v4 }
   0x9   :  { %772 = vmatpush3.msra.mxu0 %v49_v4 }
   0xa   :  { %773 = vmatprep.subr.mxu0 %v48_v5 }
   0xb   :  { %12 = vsyncpa [#allocation3], 0  ;;  %774 = vmatpush3.msra.mxu0 %v48_v5  ;;  %v46_v9 = vld [vmem:[%s1143_s1 + $0x18] sm:$0xff]  ;;  %810 = vmatpush3.msk.msra.mxu1 %vm337_vm2, %v280_v7  ;;  %v278_v10 = vld [vmem:[%s1145_s3 + $0x20] sm:$0xff]  ;;  %vm288_vm3 = vcmask 408576   ;;  %vm910_vm4 = vmmov 0  }
   0xc   :  { %775 = vmatprep.subr.mxu0 %v47_v6  ;;  %811 = vmatprep.subr.mxu1 %v279_v8  ;;  %v45_v11 = vld [vmem:[%s1143_s1 + $0x10] sm:$0xff]  ;;  %v44_v12 = vld [vmem:[%s1143_s1 + $0x8] sm:$0xff]  ;;  %v43_v13 = vld [vmem:[%s1143_s1] sm:$0xff]  ;;  %vm509_vm5 = vcmask 162816   ;;  %s912_s22 = smov [#allocation2]  }
   0xd   :  { %776 = vmatpush3.msra.mxu0 %v47_v6  ;;  %812 = vmatpush3.msra.mxu1 %v279_v8  ;;  %v28_v14 = vld [vmem:[%s1142_s0 + $0x8] sm:$0xff]  ;;  %v29_v15 = vld [vmem:[%s1142_s0 + $0x10] sm:$0xff]  ;;  %v30_v16 = vld [vmem:[%s1142_s0 + $0x18] sm:$0xff]  ;;  %s638_s23 = sshll.u32 %s912_s22, 4  ;;  %s639_s23 = int_to_ptr.vmem [resolvable:$true] %s638_s23 }
   0xe   :  { %777 = vmatprep.subr.mxu0 %v46_v9  ;;  %813 = vmatprep.subr.mxu1 %v278_v10  ;;  %v31_v17 = vld [vmem:[%s1142_s0 + $0x20] sm:$0xff]  ;;  %v32_v18 = vld [vmem:[%s1142_s0 + $0x28] sm:$0xff]  ;;  %v33_v19 = vld [vmem:[%s1142_s0 + $0x30] sm:$0xff]  ;;  %s887_s24 = scalar_lea.vmem %s639_s23, 128  ;;  %p892_p1 = scmp.lt.s32.totalorder %s639_s23, %s639_s23 }
   0xf   :  { %778 = vmatpush3.msra.mxu0 %v46_v9  ;;  %814 = vmatpush3.msra.mxu1 %v278_v10  ;;  %v34_v20 = vld [vmem:[%s1142_s0 + $0x38] sm:$0xff]  ;;  %v35_v21 = vld [vmem:[%s1142_s0 + $0x40] sm:$0xff]  ;;  %v36_v22 = vld [vmem:[%s1142_s0 + $0x48] sm:$0xff]  ;;  %p888_p0 = scmp.ne.s32.totalorder %s639_s23, %s887_s24  ;;  %p893_p2 = scmp.lt.s32.totalorder %s887_s24, %s887_s24 }
  0x10   :  { %779 = vmatprep.subr.mxu0 %v45_v11  ;;  %v37_v23 = vld [vmem:[%s1142_s0 + $0x50] sm:$0xff]  ;;  %v38_v24 = vld [vmem:[%s1142_s0 + $0x58] sm:$0xff]  ;;  %v39_v25 = vld [vmem:[%s1142_s0 + $0x60] sm:$0xff] }
  0x11   :  { %780 = vmatpush3.msra.mxu0 %v45_v11  ;;  %v40_v26 = vld [vmem:[%s1142_s0 + $0x68] sm:$0xff]  ;;  %v41_v27 = vld [vmem:[%s1142_s0 + $0x70] sm:$0xff]  ;;  %v42_v28 = vld [vmem:[%s1142_s0 + $0x78] sm:$0xff]  ;;  %p894_p3 = por %p893_p2, %p892_p1 }
  0x12   :  { %781 = vmatprep.subr.mxu0 %v44_v12  ;;  %v277_v29 = vld [vmem:[%s1145_s3 + $0x18] sm:$0xff]  ;;  %v276_v30 = vld [vmem:[%s1145_s3 + $0x10] sm:$0xff]  ;;  %v275_v31 = vld [vmem:[%s1145_s3 + $0x8] sm:$0xff] }
  0x13   :  { %782 = vmatpush3.msra.mxu0 %v44_v12  ;;  %815 = vmatprep.subr.mxu1 %v277_v29  ;;  %v274_v32 = vld [vmem:[%s1145_s3] sm:$0xff]  ;;  %p895_p4 = pnand %p894_p3, %p888_p0 }
  0x14   :  { %783 = vmatprep.subr.mxu0 %v43_v13  ;;  %816 = vmatpush3.msra.mxu1 %v277_v29  ;;  %v646_v33 = vld [vmem:[%s1144_s2] ss:$0 sm:$0xff] }
  0x15   :  { %784 = vmatpush3.msra.mxu0 %v43_v13  ;;  %817 = vmatprep.subr.mxu1 %v276_v30 }
  0x16   :  { %786 = vmatmul.mubr.msk.f32.vlgmr.msra.gmra.mxu0 %vm60_vm1, %v28_v14  ;;  %818 = vmatpush3.msra.mxu1 %v276_v30 }
  0x17   :  { %788 = vmatprep.mubr.msk.f32.mxu0 %vm60_vm1, %v29_v15  ;;  %819 = vmatprep.subr.mxu1 %v275_v31 }
  0x18   :  { %820 = vmatpush3.msra.mxu1 %v275_v31 }
  0x19   :  { %821 = vmatprep.subr.mxu1 %v274_v32 }
  0x1a   :  { %789 = vmatmul.mubr.msk.f32.gmra.mxu0 %vm60_vm1, %v30_v16  ;;  %822 = vmatpush3.msra.mxu1 %v274_v32 }
  0x1b   :  { %791 = vmatprep.mubr.msk.f32.mxu0 %vm60_vm1, %v31_v17 }
  0x1e   :  { %792 = vmatmul.mubr.msk.f32.gmra.mxu0 %vm60_vm1, %v32_v18  ;;  %v909_v18 = vmov 0.0  }
  0x1f   :  { %794 = vmatprep.mubr.msk.f32.mxu0 %vm60_vm1, %v33_v19  ;;  %847 = vmatprep.subr.mxu1 %v909_v18  ;;  %v503_v19 = vld [vmem:[%s1148_s6] sm:$0xff] }
  0x22   :  { %795 = vmatmul.mubr.msk.f32.gmra.mxu0 %vm60_vm1, %v34_v20  ;;  %v911_v20 = vmov 0  }
  0x23   :  { %797 = vmatprep.mubr.msk.f32.mxu0 %vm60_vm1, %v35_v21  ;;  %886 = vset.pattern.permute.xlu0 %v911_v20 }
  0x24   :  { %506 = vperm.xlu0 %886, %v503_v19  }
  0x26   :  { %798 = vmatmul.mubr.msk.f32.gmra.mxu0 %vm60_vm1, %v36_v22 }
  0x27   :  { %800 = vmatprep.mubr.msk.f32.mxu0 %vm60_vm1, %v37_v23 }
  0x2a   :  { %801 = vmatmul.mubr.msk.f32.gmra.mxu0 %vm60_vm1, %v38_v24 }
  0x2b   :  { %803 = vmatprep.mubr.msk.f32.mxu0 %vm60_vm1, %v39_v25 }
  0x2e   :  { %804 = vmatmul.mubr.msk.f32.gmra.mxu0 %vm60_vm1, %v40_v26 }
  0x2f   :  { %806 = vmatprep.mubr.msk.f32.mxu0 %vm60_vm1, %v41_v27 }
  0x32   :  { %807 = vmatmul.mubr.msk.f32.gmra.mxu0 %vm60_vm1, %v42_v28 }
  0xd6   :  { %v787_v34 = vpop.f32.mrf.mxu0 }
  0xd7   :  { %v185_v35 = vadd.f32 %v787_v34, %v646_v33 }
  0xd8   :  { %v179_v36 = vpop.f32.mrf.mxu0 }
  0xd9   :  { %v180_v37 = vadd.f32 %v646_v33, %v179_v36  ;;  %v259_v40 = vmax.f32 %v185_v35, 0.0  ;;  %v664_v35 = vld [vmem:[%s1146_s4] ss:$0 sm:$0xff] }
  0xda   :  { %v790_v38 = vpop.f32.mrf.mxu0 }
  0xdb   :  { %v258_v39 = vmax.f32 %v180_v37, 0.0  ;;  %v195_v41 = vadd.f32 %v790_v38, %v646_v33 }
  0xdc   :  { %v189_v42 = vpop.f32.mrf.mxu0 }
  0xdd   :  { %v190_v43 = vadd.f32 %v646_v33, %v189_v42  ;;  %823 = vmatprep.mubr.msk.f32.mxu1 %vm288_vm3, %v258_v39  ;;  %v261_v46 = vmax.f32 %v195_v41, 0.0 }
  0xde   :  { %v793_v44 = vpop.f32.mrf.mxu0  ;;  %824 = vmatmul.mubr.msk.f32.vlgmr.msra.gmra.mxu1 %vm288_vm3, %v259_v40 }
  0xdf   :  { %v260_v45 = vmax.f32 %v190_v43, 0.0  ;;  %v205_v47 = vadd.f32 %v793_v44, %v646_v33 }
  0xe0   :  { %v199_v48 = vpop.f32.mrf.mxu0 }
  0xe1   :  { %v200_v49 = vadd.f32 %v646_v33, %v199_v48  ;;  %826 = vmatprep.mubr.msk.f32.mxu1 %vm288_vm3, %v260_v45  ;;  %v263_v52 = vmax.f32 %v205_v47, 0.0 }
  0xe2   :  { %v796_v50 = vpop.f32.mrf.mxu0  ;;  %827 = vmatmul.mubr.msk.f32.gmra.mxu1 %vm288_vm3, %v261_v46 }
  0xe3   :  { %v262_v51 = vmax.f32 %v200_v49, 0.0  ;;  %v215_v53 = vadd.f32 %v796_v50, %v646_v33 }
  0xe4   :  { %v209_v54 = vpop.f32.mrf.mxu0 }
  0xe5   :  { %v210_v55 = vadd.f32 %v646_v33, %v209_v54  ;;  %829 = vmatprep.mubr.msk.f32.mxu1 %vm288_vm3, %v262_v51  ;;  %v265_v58 = vmax.f32 %v215_v53, 0.0 }
  0xe6   :  { %v799_v56 = vpop.f32.mrf.mxu0  ;;  %830 = vmatmul.mubr.msk.f32.gmra.mxu1 %vm288_vm3, %v263_v52 }
  0xe7   :  { %v264_v57 = vmax.f32 %v210_v55, 0.0  ;;  %v225_v59 = vadd.f32 %v799_v56, %v646_v33 }
  0xe8   :  { %v219_v60 = vpop.f32.mrf.mxu0 }
  0xe9   :  { %v220_v61 = vadd.f32 %v646_v33, %v219_v60  ;;  %832 = vmatprep.mubr.msk.f32.mxu1 %vm288_vm3, %v264_v57  ;;  %v267_v0 = vmax.f32 %v225_v59, 0.0 }
  0xea   :  { %v802_v62 = vpop.f32.mrf.mxu0  ;;  %833 = vmatmul.mubr.msk.f32.gmra.mxu1 %vm288_vm3, %v265_v58 }
  0xeb   :  { %v266_v63 = vmax.f32 %v220_v61, 0.0  ;;  %v235_v1 = vadd.f32 %v802_v62, %v646_v33 }
  0xec   :  { %v229_v2 = vpop.f32.mrf.mxu0 }
  0xed   :  { %v230_v3 = vadd.f32 %v646_v33, %v229_v2  ;;  %835 = vmatprep.mubr.msk.f32.mxu1 %vm288_vm3, %v266_v63  ;;  %v269_v6 = vmax.f32 %v235_v1, 0.0 }
  0xee   :  { %v805_v4 = vpop.f32.mrf.mxu0  ;;  %836 = vmatmul.mubr.msk.f32.gmra.mxu1 %vm288_vm3, %v267_v0 }
  0xef   :  { %v268_v5 = vmax.f32 %v230_v3, 0.0  ;;  %v245_v7 = vadd.f32 %v805_v4, %v646_v33 }
  0xf0   :  { %v239_v8 = vpop.f32.mrf.mxu0 }
  0xf1   :  { %v240_v9 = vadd.f32 %v646_v33, %v239_v8  ;;  %838 = vmatprep.mubr.msk.f32.mxu1 %vm288_vm3, %v268_v5  ;;  %v271_v12 = vmax.f32 %v245_v7, 0.0  ;;  %v507_v7 = vpop.permute.xlu0 %506 }
  0xf2   :  { %v808_v10 = vpop.f32.mrf.mxu0  ;;  %839 = vmatmul.mubr.msk.f32.gmra.mxu1 %vm288_vm3, %v269_v6  ;;  %v502_v6 = vld [vmem:[%s1147_s5] sm:$0xff] }
  0xf3   :  { %v270_v11 = vmax.f32 %v240_v9, 0.0  ;;  %v255_v13 = vadd.f32 %v808_v10, %v646_v33 }
  0xf4   :  { %v249_v14 = vpop.f32.mrf.mxu0 }
  0xf5   :  { %v250_v15 = vadd.f32 %v646_v33, %v249_v14  ;;  %841 = vmatprep.mubr.msk.f32.mxu1 %vm288_vm3, %v270_v11  ;;  %v273_v17 = vmax.f32 %v255_v13, 0.0 }
  0xf6   :  { %842 = vmatmul.mubr.msk.f32.gmra.mxu1 %vm288_vm3, %v271_v12 }
  0xf7   :  { %v272_v16 = vmax.f32 %v250_v15, 0.0 }
  0xf9   :  { %844 = vmatprep.mubr.msk.f32.mxu1 %vm288_vm3, %v272_v16 }
  0xfa   :  { %845 = vmatmul.mubr.msk.f32.gmra.mxu1 %vm288_vm3, %v273_v17 }
  0xfb   :  { %879 = vmatprep.mubr.msk.f32.mxu1 %vm910_vm4, %v909_v18 }
 0x19e   :  { %v1092_v21 = vpop.f32.mrf.mxu1 }
 0x19f   :  { %v413_v1 = vadd.f32 %v1092_v21, %v664_v35 }
 0x1a0   :  { %v1094_v22 = vpop.f32.mrf.mxu1 }
 0x1a1   :  { %v487_v3 = vmax.f32 %v413_v1, 0.0  ;;  %v408_v4 = vadd.f32 %v664_v35, %v1094_v22 }
 0x1a2   :  { %v828_v23 = vpop.f32.mrf.mxu1 }
 0x1a3   :  { %v423_v61 = vadd.f32 %v828_v23, %v664_v35  ;;  %v486_v5 = vmax.f32 %v408_v4, 0.0 }
 0x1a4   :  { %v1096_v24 = vpop.f32.mrf.mxu1 }
 0x1a5   :  { %v489_v63 = vmax.f32 %v423_v61, 0.0  ;;  %v418_v0 = vadd.f32 %v664_v35, %v1096_v24 }
 0x1a6   :  { %v831_v25 = vpop.f32.mrf.mxu1 }
 0x1a7   :  { %v433_v57 = vadd.f32 %v831_v25, %v664_v35  ;;  %v488_v2 = vmax.f32 %v418_v0, 0.0 }
 0x1a8   :  { %v427_v26 = vpop.f32.mrf.mxu1 }
 0x1a9   :  { %v491_v59 = vmax.f32 %v433_v57, 0.0  ;;  %v428_v60 = vadd.f32 %v664_v35, %v427_v26 }
 0x1aa   :  { %v834_v27 = vpop.f32.mrf.mxu1 }
 0x1ab   :  { %v443_v53 = vadd.f32 %v834_v27, %v664_v35  ;;  %v490_v62 = vmax.f32 %v428_v60, 0.0 }
 0x1ac   :  { %v437_v28 = vpop.f32.mrf.mxu1 }
 0x1ad   :  { %v493_v55 = vmax.f32 %v443_v53, 0.0  ;;  %v438_v56 = vadd.f32 %v664_v35, %v437_v28 }
 0x1ae   :  { %v837_v29 = vpop.f32.mrf.mxu1 }
 0x1af   :  { %v453_v49 = vadd.f32 %v837_v29, %v664_v35  ;;  %v492_v58 = vmax.f32 %v438_v56, 0.0 }
 0x1b0   :  { %v447_v30 = vpop.f32.mrf.mxu1 }
 0x1b1   :  { %v495_v51 = vmax.f32 %v453_v49, 0.0  ;;  %v448_v52 = vadd.f32 %v664_v35, %v447_v30 }
 0x1b2   :  { %v840_v31 = vpop.f32.mrf.mxu1 }
 0x1b3   :  { %v463_v45 = vadd.f32 %v840_v31, %v664_v35  ;;  %v494_v54 = vmax.f32 %v448_v52, 0.0 }
 0x1b4   :  { %v457_v32 = vpop.f32.mrf.mxu1 }
 0x1b5   :  { %v497_v47 = vmax.f32 %v463_v45, 0.0  ;;  %v458_v48 = vadd.f32 %v664_v35, %v457_v32 }
 0x1b6   :  { %v843_v33 = vpop.f32.mrf.mxu1 }
 0x1b7   :  { %v473_v41 = vadd.f32 %v843_v33, %v664_v35  ;;  %v496_v50 = vmax.f32 %v458_v48, 0.0 }
 0x1b8   :  { %v467_v34 = vpop.f32.mrf.mxu1 }
 0x1b9   :  { %v499_v43 = vmax.f32 %v473_v41, 0.0  ;;  %v468_v44 = vadd.f32 %v664_v35, %v467_v34 }
 0x1ba   :  { %v846_v36 = vpop.f32.mrf.mxu1 }
 0x1bb   :  { %v483_v37 = vadd.f32 %v846_v36, %v664_v35  ;;  %v498_v46 = vmax.f32 %v468_v44, 0.0 }
 0x1bc   :  { %v477_v38 = vpop.f32.mrf.mxu1 }
 0x1bd   :  { %v501_v39 = vmax.f32 %v483_v37, 0.0  ;;  %v478_v40 = vadd.f32 %v664_v35, %v477_v38 }
 0x1bf   :  { %848 = vmatpush3.xpose.msk.msra.mxu1 %vm509_vm5, %v501_v39  ;;  %v500_v42 = vmax.f32 %v478_v40, 0.0 }
 0x1c0   :  { %849 = vmatprep.subr.mxu1 %v909_v18 }
 0x1c3   :  { %850 = vmatpush3.xpose.msk.msra.mxu1 %vm509_vm5, %v500_v42 }
 0x1c4   :  { %851 = vmatprep.subr.mxu1 %v909_v18 }
 0x1c7   :  { %852 = vmatpush3.xpose.msk.msra.mxu1 %vm509_vm5, %v499_v43 }
 0x1c8   :  { %853 = vmatprep.subr.mxu1 %v909_v18 }
 0x1cb   :  { %854 = vmatpush3.xpose.msk.msra.mxu1 %vm509_vm5, %v498_v46 }
 0x1cc   :  { %855 = vmatprep.subr.mxu1 %v909_v18 }
 0x1cf   :  { %856 = vmatpush3.xpose.msk.msra.mxu1 %vm509_vm5, %v497_v47 }
 0x1d0   :  { %857 = vmatprep.subr.mxu1 %v909_v18 }
 0x1d3   :  { %858 = vmatpush3.xpose.msk.msra.mxu1 %vm509_vm5, %v496_v50 }
 0x1d4   :  { %859 = vmatprep.subr.mxu1 %v909_v18 }
 0x1d7   :  { %860 = vmatpush3.xpose.msk.msra.mxu1 %vm509_vm5, %v495_v51 }
 0x1d8   :  { %861 = vmatprep.subr.mxu1 %v909_v18 }
 0x1db   :  { %862 = vmatpush3.xpose.msk.msra.mxu1 %vm509_vm5, %v494_v54 }
 0x1dc   :  { %863 = vmatprep.subr.mxu1 %v909_v18 }
 0x1df   :  { %864 = vmatpush3.xpose.msk.msra.mxu1 %vm509_vm5, %v493_v55 }
 0x1e0   :  { %865 = vmatprep.subr.mxu1 %v909_v18 }
 0x1e3   :  { %866 = vmatpush3.xpose.msk.msra.mxu1 %vm509_vm5, %v492_v58 }
 0x1e4   :  { %867 = vmatprep.subr.mxu1 %v909_v18 }
 0x1e7   :  { %868 = vmatpush3.xpose.msk.msra.mxu1 %vm509_vm5, %v491_v59 }
 0x1e8   :  { %869 = vmatprep.subr.mxu1 %v909_v18 }
 0x1eb   :  { %870 = vmatpush3.xpose.msk.msra.mxu1 %vm509_vm5, %v490_v62 }
 0x1ec   :  { %871 = vmatprep.subr.mxu1 %v909_v18 }
 0x1ef   :  { %872 = vmatpush3.xpose.msk.msra.mxu1 %vm509_vm5, %v489_v63 }
 0x1f0   :  { %873 = vmatprep.subr.mxu1 %v909_v18 }
 0x1f3   :  { %874 = vmatpush3.xpose.msk.msra.mxu1 %vm509_vm5, %v488_v2 }
 0x1f4   :  { %875 = vmatprep.subr.mxu1 %v909_v18 }
 0x1f7   :  { %876 = vmatpush3.xpose.msk.msra.mxu1 %vm509_vm5, %v487_v3 }
 0x1f8   :  { %877 = vmatprep.subr.mxu1 %v909_v18 }
 0x1fb   :  { %878 = vmatpush3.xpose.msk.msra.mxu1 %vm509_vm5, %v486_v5 }
 0x1fe   :  { %880 = vmatmul.mubr.msk.f32.vlgmr.msra.gmra.mxu1 %vm509_vm5, %v502_v6 }
 0x2be   :  { %v627_v8 = vpop.f32.mrf.mxu1 }
 0x2bf   :  { %v628_v9 = vadd.f32 %v627_v8, %v507_v7 }
 0x2c0   :  { %v881_v10 = vpop.f32.mrf.mxu1 }
 0x2c1   :  { %631 = vst [vmem:[#allocation2] sm:$0xff] %v628_v9 }
 0x2c2   :  { %898 = shalt.err (!%p895_p4)
}
 0x2c3   :  { %641 = dma.vmem_to_hbm [thread:$0]  %s639_s23, 128, %s1149_s7, [#allocation3]  }
 0x2c4   :  { %907 = dma.done.wait [#allocation3], 128  }
 0x2c5   :  { %908 = vsyncadd [#allocation3], 4294967168 }
 0x2c6   :  { %645 = vsyncpa [#allocation3], 1 }

</bundles_post_ra>
